<compile_context>
chip_gen: v7x
topology: tpu7x:2x2x1
jax: 0.10.0
libtpu: 0.0.40
codegen_flags: <defaults>
</compile_context>

<pallas_src>
import jax
import jax.numpy as jnp
from jax.experimental import pallas as pl
from jax.experimental.pallas import tpu as pltpu

LOG_SIG_MAX = 2.0
LOG_SIG_MIN = -20.0

LANE = 128      # vreg lane width
SUBLANE = 8     # vreg sublane height (f32)


def _round_up(n, m):
    return ((n + m - 1) // m) * m


def _choose_tb(batch):
    """Batch-tile height: >=2 grid steps when possible (v7x megacore), <=1024."""
    if batch <= SUBLANE:
        return _round_up(max(batch, 1), SUBLANE)
    half = _round_up((batch + 1) // 2, SUBLANE)
    return min(1024, half)


def make_policy_kernel(hidden_pad, out2_pad):
    """Kernel factory closing over the (static) padded feature widths."""

    def kernel(x_ref, w1_ref, w2h_ref, b_ref, out_ref):
        # Packed per-lane constants (f32): biases + clamp bounds.
        b = b_ref[...]                           # (8, BW)
        b1 = b[0:1, :hidden_pad]                 # (1, H_P)
        b2 = b[1:2, :hidden_pad]                 # (1, H_P)
        bh = b[2:3, :out2_pad]                   # (1, OUT2_P) = [bm | bs | 0]
        lo = b[3:4, :out2_pad]                   # -inf (mean lanes) / LOG_SIG_MIN
        hi = b[4:5, :out2_pad]                   # +inf (mean lanes) / LOG_SIG_MAX

        # fc1 + relu : bf16 MXU operands, f32 accumulate + f32 epilogue.
        x = x_ref[...].astype(jnp.bfloat16)      # (TB, IN)
        h1 = jnp.dot(x, w1_ref[...], preferred_element_type=jnp.float32) + b1
        h1 = jnp.maximum(h1, 0.0)

        # fc2 + relu : W2 is the left 128-aligned slice of the fused slab.
        h2 = jnp.dot(h1.astype(jnp.bfloat16), w2h_ref[:, :hidden_pad],
                     preferred_element_type=jnp.float32) + b2
        h2 = jnp.maximum(h2, 0.0)

        # fused heads: [mean | log_std | pad] in one lane-dense slab.
        y = jnp.dot(h2.astype(jnp.bfloat16),
                    w2h_ref[:, hidden_pad:hidden_pad + out2_pad],
                    preferred_element_type=jnp.float32) + bh

        # per-lane clamp: no-op on mean lanes, clip on log_std lanes.
        out_ref[...] = jnp.minimum(jnp.maximum(y, lo), hi)

    return kernel


def xavier_uniform(key, fan_in, fan_out, gain=1.0):
    # matches torch.nn.init.xavier_uniform_ semantics
    limit = gain * jnp.sqrt(6.0 / (fan_in + fan_out))
    return jax.random.uniform(key, (fan_in, fan_out), jnp.float32, -limit, limit)


def init_policy_params(key, input_size, output_size, hidden_dim):
    """Raw (unpadded) params; weights stored as (in, out) = W.T of nn.Linear."""
    k1, k2, k3, k4 = jax.random.split(key, 4)
    return {
        "w1": xavier_uniform(k1, input_size, hidden_dim),
        "b1": jnp.zeros((hidden_dim,), jnp.float32),
        "w2": xavier_uniform(k2, hidden_dim, hidden_dim),
        "b2": jnp.zeros((hidden_dim,), jnp.float32),
        "wm": xavier_uniform(k3, hidden_dim, output_size),
        "bm": jnp.zeros((output_size,), jnp.float32),
        "ws": xavier_uniform(k4, hidden_dim, output_size),
        "bs": jnp.zeros((output_size,), jnp.float32),
    }


def prepare_params(params, input_size, hidden_dim, output_size):
    """One-time: pad to lane-aligned layout, fuse fc2+heads, cast to bf16,
    pack biases + clamp bounds."""
    h_p = _round_up(hidden_dim, LANE)
    out2_p = _round_up(2 * output_size, LANE)
    bw = max(h_p, out2_p)

    def pad2(a, rows, cols):
        return jnp.pad(a, ((0, rows - a.shape[0]), (0, cols - a.shape[1])))

    # fc1 weight: keep true contraction dim (no x padding), pad only out lanes.
    w1 = pad2(params["w1"], input_size, h_p).astype(jnp.bfloat16)

    # Fused slab: [ W2 | Wm | Ws | 0 ] along the lane axis (128-aligned slices).
    w2 = pad2(params["w2"], h_p, h_p)
    wh = pad2(jnp.concatenate([params["wm"], params["ws"]], axis=1), h_p, out2_p)
    w2h = jnp.concatenate([w2, wh], axis=1).astype(jnp.bfloat16)

    # Packed biases + per-lane clamp bounds (single (8, bw) f32 buffer).
    lane = jnp.arange(out2_p)
    is_log_std = (lane >= output_size) & (lane < 2 * output_size)
    lo = jnp.where(is_log_std, LOG_SIG_MIN, -jnp.inf).astype(jnp.float32)
    hi = jnp.where(is_log_std, LOG_SIG_MAX, jnp.inf).astype(jnp.float32)

    b = jnp.zeros((SUBLANE, bw), jnp.float32)
    b = b.at[0, :hidden_dim].set(params["b1"])
    b = b.at[1, :hidden_dim].set(params["b2"])
    b = b.at[2, :2 * output_size].set(
        jnp.concatenate([params["bm"], params["bs"]]))
    b = b.at[3, :out2_p].set(lo)
    b = b.at[4, :out2_p].set(hi)

    return {"w1": w1, "w2h": w2h, "bias": b}


def make_policy_forward(input_size, hidden_dim, output_size):
    """Returns a jitted forward(x, w1, w2h, bias) -> (mean, log_std)."""
    h_p = _round_up(hidden_dim, LANE)
    out2_p = _round_up(2 * output_size, LANE)
    bw = max(h_p, out2_p)
    kernel = make_policy_kernel(h_p, out2_p)

    @jax.jit
    def forward(x, w1, w2h, bias):
        batch = x.shape[0]
        tb = _choose_tb(batch)
        pb = _round_up(batch, tb)

        x_f = x.astype(jnp.float32)
        if pb != batch:
            x_f = jnp.pad(x_f, ((0, pb - batch), (0, 0)))   # batch rows only

        # VMEM budget hint sized from the actual resident slabs (+ headroom),
        # capped at v7x's 64 MiB physical ceiling.
        weight_bytes = 2 * (w1.size + w2h.size) * 2          # bf16, double-buffered
        bias_bytes = 2 * bias.size * 4
        io_bytes = 2 * tb * input_size * 4 + 2 * tb * out2_p * 4
        interm_bytes = 4 * tb * h_p * 4
        vmem_limit = weight_bytes + bias_bytes + io_bytes + interm_bytes + (8 << 20)
        vmem_limit = int(max(16 << 20, min(vmem_limit, 64 << 20)))

        out = pl.pallas_call(
            kernel,
            out_shape=jax.ShapeDtypeStruct((pb, out2_p), jnp.float32),
            grid=(pb // tb,),
            in_specs=[
                pl.BlockSpec((tb, input_size), lambda i: (i, 0)),     # x: tiled over batch
                pl.BlockSpec((input_size, h_p), lambda i: (0, 0)),    # W1 resident
                pl.BlockSpec((h_p, h_p + out2_p), lambda i: (0, 0)),  # [W2 | Whead] resident
                pl.BlockSpec((SUBLANE, bw), lambda i: (0, 0)),        # biases + clamp bounds
            ],
            out_specs=pl.BlockSpec((tb, out2_p), lambda i: (i, 0)),
            compiler_params=pltpu.CompilerParams(
                dimension_semantics=("parallel",),   # batch axis -> megacore/v7x sharding
                vmem_limit_bytes=vmem_limit,
            ),
        )(x_f, w1, w2h, bias)

        mean = out[:batch, :output_size]
        log_std = out[:batch, output_size:2 * output_size]
        return mean, log_std

    return forward


if __name__ == "__main__":
    batch, input_size, hidden_dim, output_size = 2, 16, 32, 8

    key = jax.random.PRNGKey(0)
    pkey, xkey = jax.random.split(key)

    raw = init_policy_params(pkey, input_size, output_size, hidden_dim)
    dev = prepare_params(raw, input_size, hidden_dim, output_size)
    forward = make_policy_forward(input_size, hidden_dim, output_size)

    x = jax.random.normal(xkey, (batch, input_size), jnp.float32)
    mean, log_std = forward(x, dev["w1"], dev["w2h"], dev["bias"])
    jax.block_until_ready((mean, log_std))

    # --- references ---
    # f32 reference (same math as PyTorch forward)
    h1 = jnp.maximum(x @ raw["w1"] + raw["b1"][None, :], 0.0)
    h2 = jnp.maximum(h1 @ raw["w2"] + raw["b2"][None, :], 0.0)
    ref_mean_f32 = h2 @ raw["wm"] + raw["bm"][None, :]
    ref_ls_f32 = jnp.clip(h2 @ raw["ws"] + raw["bs"][None, :],
                          LOG_SIG_MIN, LOG_SIG_MAX)

    # bf16-operand reference matching the kernel's mixed precision
    bf = jnp.bfloat16
    h1b = jnp.maximum(jnp.dot(x.astype(bf), raw["w1"].astype(bf),
                              preferred_element_type=jnp.float32)
                      + raw["b1"][None, :], 0.0)
    h2b = jnp.maximum(jnp.dot(h1b.astype(bf), raw["w2"].astype(bf),
                              preferred_element_type=jnp.float32)
                      + raw["b2"][None, :], 0.0)
    ref_mean_bf = jnp.dot(h2b.astype(bf), raw["wm"].astype(bf),
                          preferred_element_type=jnp.float32) + raw["bm"][None, :]
    ref_ls_bf = jnp.clip(jnp.dot(h2b.astype(bf), raw["ws"].astype(bf),
                                 preferred_element_type=jnp.float32)
                         + raw["bs"][None, :], LOG_SIG_MIN, LOG_SIG_MAX)

    assert mean.shape == (batch, output_size)
    assert log_std.shape == (batch, output_size)
    # tight check vs. bf16-emulated reference
    assert jnp.allclose(mean, ref_mean_bf, atol=2e-3, rtol=2e-3), \
        float(jnp.abs(mean - ref_mean_bf).max())
    assert jnp.allclose(log_std, ref_ls_bf, atol=2e-3, rtol=2e-3), \
        float(jnp.abs(log_std - ref_ls_bf).max())
    # loose sanity check vs. full-f32 reference (bf16 operand rounding)
    assert jnp.allclose(mean, ref_mean_f32, atol=5e-2, rtol=5e-2), \
        float(jnp.abs(mean - ref_mean_f32).max())
    assert jnp.allclose(log_std, ref_ls_f32, atol=5e-2, rtol=5e-2), \
        float(jnp.abs(log_std - ref_ls_f32).max())

    # TODO(synk): Policy.sample() (Normal rsample / tanh / log_prob) is not part
    # of forward() and is left to plain JAX outside the kernel.
    print("KERNEL_OK")
</pallas_src>

<mosaic_0001>
module attributes {stable_mosaic.version = 11 : i64} {
  func.func @kernel(%arg0: i32, %arg1: memref<8x16xf32, #tpu.memory_space<vmem>>, %arg2: memref<16x128xbf16, #tpu.memory_space<vmem>>, %arg3: memref<128x256xbf16, #tpu.memory_space<vmem>>, %arg4: memref<8x128xf32, #tpu.memory_space<vmem>>, %arg5: memref<8x128xf32, #tpu.memory_space<vmem>>) attributes {dimension_semantics = [#tpu.dimension_semantics<parallel>], iteration_bounds = array<i64: 1>, scalar_prefetch = 0 : i64, scratch_operands = 0 : i64, tpu.core_type = #tpu.core_type<tc>, window_params = [{transform_indices = @transform_0, window_bounds = array<i64: 8, 16>}, {pipeline_mode = #tpu.pipeline_mode<synchronous>, transform_indices = @transform_1, window_bounds = array<i64: 16, 128>}, {pipeline_mode = #tpu.pipeline_mode<synchronous>, transform_indices = @transform_2, window_bounds = array<i64: 128, 256>}, {pipeline_mode = #tpu.pipeline_mode<synchronous>, transform_indices = @transform_3, window_bounds = array<i64: 8, 128>}, {transform_indices = @transform_4, window_bounds = array<i64: 8, 128>}]} {
    %c0 = arith.constant 0 : index
    %c0_0 = arith.constant 0 : index
    %0 = vector.load %arg4[%c0, %c0_0] : memref<8x128xf32, #tpu.memory_space<vmem>>, vector<8x128xf32>
    %1 = vector.extract_strided_slice %0 {offsets = [0, 0], sizes = [1, 128], strides = [1, 1]} : vector<8x128xf32> to vector<1x128xf32>
    %2 = vector.extract_strided_slice %0 {offsets = [1, 0], sizes = [1, 128], strides = [1, 1]} : vector<8x128xf32> to vector<1x128xf32>
    %3 = vector.extract_strided_slice %0 {offsets = [2, 0], sizes = [1, 128], strides = [1, 1]} : vector<8x128xf32> to vector<1x128xf32>
    %4 = vector.extract_strided_slice %0 {offsets = [3, 0], sizes = [1, 128], strides = [1, 1]} : vector<8x128xf32> to vector<1x128xf32>
    %5 = vector.extract_strided_slice %0 {offsets = [4, 0], sizes = [1, 128], strides = [1, 1]} : vector<8x128xf32> to vector<1x128xf32>
    %c0_1 = arith.constant 0 : index
    %c0_2 = arith.constant 0 : index
    %6 = vector.load %arg1[%c0_1, %c0_2] : memref<8x16xf32, #tpu.memory_space<vmem>>, vector<8x16xf32>
    %7 = arith.truncf %6 : vector<8x16xf32> to vector<8x16xbf16>
    %c0_3 = arith.constant 0 : index
    %c0_4 = arith.constant 0 : index
    %8 = vector.load %arg2[%c0_3, %c0_4] : memref<16x128xbf16, #tpu.memory_space<vmem>>, vector<16x128xbf16>
    %cst = arith.constant dense<0.000000e+00> : vector<8x128xf32>
    %9 = tpu.matmul %7, %8, %cst {dimension_numbers = #tpu.dot_dimension_numbers<[1], [0], [0], [1], [0, 0, 1, 1], [], []>} : vector<8x16xbf16>, vector<16x128xbf16>, vector<8x128xf32> -> vector<8x128xf32>
    %10 = vector.broadcast %1 : vector<1x128xf32> to vector<8x128xf32>
    %11 = arith.addf %9, %10 : vector<8x128xf32>
    %cst_5 = arith.constant 0.000000e+00 : f32
    %12 = vector.broadcast %cst_5 : f32 to vector<8x128xf32>
    %13 = arith.maximumf %11, %12 : vector<8x128xf32>
    %14 = arith.truncf %13 : vector<8x128xf32> to vector<8x128xbf16>
    %c0_6 = arith.constant 0 : index
    %c0_7 = arith.constant 0 : index
    %15 = vector.load %arg3[%c0_6, %c0_7] : memref<128x256xbf16, #tpu.memory_space<vmem>>, vector<128x128xbf16>
    %cst_8 = arith.constant dense<0.000000e+00> : vector<8x128xf32>
    %16 = tpu.matmul %14, %15, %cst_8 {dimension_numbers = #tpu.dot_dimension_numbers<[1], [0], [0], [1], [0, 0, 1, 1], [], []>} : vector<8x128xbf16>, vector<128x128xbf16>, vector<8x128xf32> -> vector<8x128xf32>
    %17 = vector.broadcast %2 : vector<1x128xf32> to vector<8x128xf32>
    %18 = arith.addf %16, %17 : vector<8x128xf32>
    %cst_9 = arith.constant 0.000000e+00 : f32
    %19 = vector.broadcast %cst_9 : f32 to vector<8x128xf32>
    %20 = arith.maximumf %18, %19 : vector<8x128xf32>
    %21 = arith.truncf %20 : vector<8x128xf32> to vector<8x128xbf16>
    %c0_10 = arith.constant 0 : index
    %c128 = arith.constant 128 : index
    %22 = vector.load %arg3[%c0_10, %c128] : memref<128x256xbf16, #tpu.memory_space<vmem>>, vector<128x128xbf16>
    %cst_11 = arith.constant dense<0.000000e+00> : vector<8x128xf32>
    %23 = tpu.matmul %21, %22, %cst_11 {dimension_numbers = #tpu.dot_dimension_numbers<[1], [0], [0], [1], [0, 0, 1, 1], [], []>} : vector<8x128xbf16>, vector<128x128xbf16>, vector<8x128xf32> -> vector<8x128xf32>
    %24 = vector.broadcast %3 : vector<1x128xf32> to vector<8x128xf32>
    %25 = arith.addf %23, %24 : vector<8x128xf32>
    %26 = vector.broadcast %4 : vector<1x128xf32> to vector<8x128xf32>
    %27 = arith.maximumf %25, %26 : vector<8x128xf32>
    %28 = vector.broadcast %5 : vector<1x128xf32> to vector<8x128xf32>
    %29 = arith.minimumf %27, %28 : vector<8x128xf32>
    %c0_12 = arith.constant 0 : index
    %c0_13 = arith.constant 0 : index
    %30 = vector.load %arg5[%c0_12, %c0_13] : memref<8x128xf32, #tpu.memory_space<vmem>>, vector<8x128xf32>
    tpu.vector_store %arg5[%c0_12, %c0_13], %29 {strides = array<i32>} : memref<8x128xf32, #tpu.memory_space<vmem>>, vector<8x128xf32>,
    return
  }
  func.func @transform_0(%arg0: i32) -> (i32, i32) {
    %c0_i32 = arith.constant 0 : i32
    %c0_i32_0 = arith.constant 0 : i32
    return %arg0, %c0_i32 : i32, i32
  }
  func.func @transform_1(%arg0: i32) -> (i32, i32) {
    %c0_i32 = arith.constant 0 : i32
    %c0_i32_0 = arith.constant 0 : i32
    %c0_i32_1 = arith.constant 0 : i32
    return %c0_i32, %c0_i32_0 : i32, i32
  }
  func.func @transform_2(%arg0: i32) -> (i32, i32) {
    %c0_i32 = arith.constant 0 : i32
    %c0_i32_0 = arith.constant 0 : i32
    %c0_i32_1 = arith.constant 0 : i32
    return %c0_i32, %c0_i32_0 : i32, i32
  }
  func.func @transform_3(%arg0: i32) -> (i32, i32) {
    %c0_i32 = arith.constant 0 : i32
    %c0_i32_0 = arith.constant 0 : i32
    %c0_i32_1 = arith.constant 0 : i32
    return %c0_i32, %c0_i32_0 : i32, i32
  }
  func.func @transform_4(%arg0: i32) -> (i32, i32) {
    %c0_i32 = arith.constant 0 : i32
    %c0_i32_0 = arith.constant 0 : i32
    return %arg0, %c0_i32 : i32, i32
  }
}

</mosaic_0001>

<bundles_post_ra>
// kernel: forward.1
= control target key start
LH: loop header
LB: loop body
LE: loop exit
PB: predicated region body
PF: predicated region fallthrough
CT: control target
= control target key end

     0   :  { %9 = vsyncpa [#allocation3], 0  ;;  %s457_s15 = smov [#allocation2]   ;;  %s531_s0 = inlined_call_operand.vmem [shape: f32[8,16], index: 0, kind: input, shape index: {}]   ;;  %s532_s1 = inlined_call_operand.vmem [shape: bf16[16,128], index: 1, kind: input, shape index: {}]   ;;  %s533_s2 = inlined_call_operand.hbm [shape: bf16[128,256], index: 2, kind: input, shape index: {}]   ;;  %s534_s3 = inlined_call_operand.vmem [shape: f32[8,128], index: 3, kind: input, shape index: {}]   ;;  %s535_s4 = inlined_call_operand.vmem [shape: f32[8,128], index: 4, kind: output, shape index: {}]  }
   0x1   :  { %s19_s16 = sshll.u32 %s457_s15, 4  ;;  %s433_s19 = scalar_lea.hbm %s533_s2, 2048  ;;  %s20_s16 = int_to_ptr.vmem [resolvable:$true] %s19_s16 }
   0x2   :  { %p434_p0 = scmp.ne.s32.totalorder %s533_s2, %s433_s19  ;;  %p437_p1 = scmp.lt.u32.totalorder %s433_s19, %s533_s2 }
   0x4   :  { %p439_p2 = pnand %p437_p1, %p434_p0 }
   0x6   :  { %442 = shalt.err (!%p439_p2)
}
   0x7   :  { %s443_s24 = scalar_lea.vmem %s20_s16, 2048  ;;  %p448_p4 = scmp.lt.s32.totalorder %s20_s16, %s20_s16 }
   0x8   :  { %p444_p3 = scmp.ne.s32.totalorder %s20_s16, %s443_s24  ;;  %p449_p5 = scmp.lt.s32.totalorder %s443_s24, %s443_s24 }
   0xa   :  { %p450_p6 = por %p449_p5, %p448_p4 }
   0xc   :  { %p451_p7 = pnand %p450_p6, %p444_p3 }
   0xe   :  { %454 = shalt.err (!%p451_p7)
}
   0xf   :  { %s458_s25 = smov 128   ;;  %s459_s26 = smov 8  }
  0x10   :  { %25 = dma.hbm_to_vmem [thread:$0]  %s533_s2, 2048, %s20_s16, [#allocation3], %s458_s25, %s458_s25, %s459_s26  }
  0x11   :  { %455 = dma.done.wait [#allocation3], 2048  }
  0x12   :  { %456 = vsyncadd [#allocation3], 4294965248  ;;  %v460_v0 = vmov 0.0   ;;  %vm461_vm0 = vmmov 0   ;;  %v416_v1 = vld [vmem:[%s532_s1] sm:$0xff]   ;;  %vm47_vm1 = vcmask 130048   ;;  %v37_v18 = vlaneseq }
  0x13   :  { %365 = vmatprep.subr.bf16.mxu0 %v460_v0  ;;  %367 = vmatprep.mubr.msk.bf16.mxu0 %vm461_vm0, %v460_v0  ;;  %v33_v2 = vld [vmem:[%s531_s0] sm:$0xff]  ;;  %v417_v4 = vld [vmem:[#allocation2] ss:$8 sps:$4 sm:$0xff]   ;;  %v425_v12 = vld [vmem:[#allocation2 + $0x4] ss:$8 sps:$4 sm:$0xff]  }
  0x14   :  { %371 = vmatprep.subr.bf16.mxu1 %v460_v0  ;;  %387 = vmatprep.mubr.msk.bf16.mxu1 %vm461_vm0, %v460_v0  ;;  %v34_v3 = vpack.c.bf16 %v33_v2, %v33_v2  ;;  %v418_v5 = vld [vmem:[#allocation2 + $0x10] ss:$8 sps:$4 sm:$0xff]   ;;  %v419_v6 = vld [vmem:[#allocation2 + $0x20] ss:$8 sps:$4 sm:$0xff]   ;;  %v426_v13 = vld [vmem:[#allocation2 + $0x14] ss:$8 sps:$4 sm:$0xff]  }
  0x15   :  { %366 = vmatpush3.bf16.msra.mxu0 %v416_v1  ;;  %372 = vmatpush3.bf16.msra.mxu1 %v417_v4  ;;  %v420_v7 = vld [vmem:[#allocation2 + $0x30] ss:$8 sps:$4 sm:$0xff]   ;;  %v421_v8 = vld [vmem:[#allocation2 + $0x40] ss:$8 sps:$4 sm:$0xff]   ;;  %v427_v14 = vld [vmem:[#allocation2 + $0x24] ss:$8 sps:$4 sm:$0xff]  }
  0x16   :  { %391 = vmatprep.subr.bf16.mxu0 %v460_v0  ;;  %373 = vmatprep.subr.bf16.mxu1 %v460_v0  ;;  %v422_v9 = vld [vmem:[#allocation2 + $0x50] ss:$8 sps:$4 sm:$0xff]   ;;  %v423_v10 = vld [vmem:[#allocation2 + $0x60] ss:$8 sps:$4 sm:$0xff]   ;;  %v428_v15 = vld [vmem:[#allocation2 + $0x34] ss:$8 sps:$4 sm:$0xff]  }
  0x17   :  { %v424_v11 = vld [vmem:[#allocation2 + $0x70] ss:$8 sps:$4 sm:$0xff]   ;;  %v429_v16 = vld [vmem:[#allocation2 + $0x44] ss:$8 sps:$4 sm:$0xff]   ;;  %v430_v17 = vld [vmem:[#allocation2 + $0x54] ss:$8 sps:$4 sm:$0xff]  }
  0x18   :  { %368 = vmatmul.mubr.msk.bf16.vlgmr.msra.gmra.mrb[0].mxu0 %vm47_vm1, %v34_v3  ;;  %v38_v19 = vshrl.u32 %v37_v18, 7  ;;  %v32_v21 = vld [vmem:[%s534_s3] sm:$0xff]  ;;  %v431_v30 = vld [vmem:[#allocation2 + $0x64] ss:$8 sps:$4 sm:$0xff]  }
  0x19   :  { %407 = vmatprep.mubr.msk.bf16.mxu0 %vm461_vm0, %v460_v0  ;;  %374 = vmatpush3.bf16.msra.mxu1 %v418_v5  ;;  %v432_v31 = vld [vmem:[#allocation2 + $0x74] ss:$8 sps:$4 sm:$0xff]  }
  0x1a   :  { %375 = vmatprep.subr.bf16.mxu1 %v460_v0  ;;  %392 = vmatpush3.bf16.msra.mxu0 %v425_v12  ;;  %v39_v20 = vsub.s32 0, %v38_v19  ;;  %v111_v32 = vsub.s32 1, %v38_v19  ;;  %v221_v41 = vsub.s32 2, %v38_v19  ;;  %v313_v42 = vsub.s32 3, %v38_v19 }
  0x1b   :  { %393 = vmatprep.subr.bf16.mxu0 %v460_v0  ;;  %v318_v44 = vsub.s32 4, %v38_v19 }
  0x1c   :  { %v40_v22 = vrot.slane %v32_v21, %v39_v20  ;;  %v112_v33 = vrot.slane %v32_v21, %v111_v32  ;;  %v222_v43 = vrot.slane %v32_v21, %v221_v41  ;;  %v314_v45 = vrot.slane %v32_v21, %v313_v42 }
  0x1d   :  { %376 = vmatpush3.bf16.msra.mxu1 %v419_v6  ;;  %v319_v48 = vrot.slane %v32_v21, %v318_v44 }
  0x1e   :  { %377 = vmatprep.subr.bf16.mxu1 %v460_v0  ;;  %394 = vmatpush3.bf16.msra.mxu0 %v426_v13 }
  0x1f   :  { %395 = vmatprep.subr.bf16.mxu0 %v460_v0 }
  0x21   :  { %378 = vmatpush3.bf16.msra.mxu1 %v420_v7 }
  0x22   :  { %379 = vmatprep.subr.bf16.mxu1 %v460_v0  ;;  %396 = vmatpush3.bf16.msra.mxu0 %v427_v14 }
  0x23   :  { %397 = vmatprep.subr.bf16.mxu0 %v460_v0 }
  0x25   :  { %380 = vmatpush3.bf16.msra.mxu1 %v421_v8 }
  0x26   :  { %381 = vmatprep.subr.bf16.mxu1 %v460_v0  ;;  %398 = vmatpush3.bf16.msra.mxu0 %v428_v15 }
  0x27   :  { %399 = vmatprep.subr.bf16.mxu0 %v460_v0 }
  0x29   :  { %382 = vmatpush3.bf16.msra.mxu1 %v422_v9 }
  0x2a   :  { %383 = vmatprep.subr.bf16.mxu1 %v460_v0  ;;  %400 = vmatpush3.bf16.msra.mxu0 %v429_v16 }
  0x2b   :  { %401 = vmatprep.subr.bf16.mxu0 %v460_v0 }
  0x2d   :  { %384 = vmatpush3.bf16.msra.mxu1 %v423_v10 }
  0x2e   :  { %385 = vmatprep.subr.bf16.mxu1 %v460_v0  ;;  %402 = vmatpush3.bf16.msra.mxu0 %v430_v17 }
  0x2f   :  { %403 = vmatprep.subr.bf16.mxu0 %v460_v0 }
  0x31   :  { %386 = vmatpush3.bf16.msra.mxu1 %v424_v11 }
  0x32   :  { %404 = vmatpush3.bf16.msra.mxu0 %v431_v30 }
  0x33   :  { %405 = vmatprep.subr.bf16.mxu0 %v460_v0 }
  0x36   :  { %406 = vmatpush3.bf16.msra.mxu0 %v432_v31 }
  0xeb   :  { %v85_v23 = vpop.f32.mrb[0].mxu0 }
  0xec   :  { %v86_v24 = vadd.f32 %v85_v23, %v40_v22  ;;  %v369_v25 = vpop.f32.mrb[1].mxu0 }
  0xed   :  { %v88_v26 = vpop.f32.mrb[2].mxu0 }
  0xee   :  { %v91_v27 = vmax.f32 %v86_v24, 0.0  ;;  %v370_v28 = vpop.f32.mrb[3].mxu0 }
  0xf0   :  { %v92_v29 = vpack.c.bf16 %v91_v27, %v91_v27 }
  0xf2   :  { %388 = vmatmul.mubr.bf16.vlgmr.msra.gmra.mrb[0].mxu1 %v92_v29 }
 0x1c5   :  { %v195_v34 = vpop.f32.mrb[0].mxu1 }
 0x1c6   :  { %v196_v35 = vadd.f32 %v195_v34, %v112_v33  ;;  %v389_v36 = vpop.f32.mrb[1].mxu1 }
 0x1c7   :  { %v198_v37 = vpop.f32.mrb[2].mxu1 }
 0x1c8   :  { %v201_v38 = vmax.f32 %v196_v35, 0.0  ;;  %v390_v39 = vpop.f32.mrb[3].mxu1 }
 0x1ca   :  { %v202_v40 = vpack.c.bf16 %v201_v38, %v201_v38 }
 0x1cc   :  { %408 = vmatmul.mubr.bf16.vlgmr.msra.gmra.mrb[4].mxu0 %v202_v40 }
 0x29f   :  { %v305_v46 = vpop.f32.mrb[4].mxu0 }
 0x2a0   :  { %v306_v47 = vadd.f32 %v305_v46, %v222_v43  ;;  %v409_v49 = vpop.f32.mrb[5].mxu0 }
 0x2a1   :  { %v308_v50 = vpop.f32.mrb[6].mxu0 }
 0x2a2   :  { %v315_v51 = vmax.f32 %v306_v47, %v314_v45  ;;  %v410_v52 = vpop.f32.mrb[7].mxu0 }
 0x2a4   :  { %v320_v53 = vmin.f32 %v315_v51, %v319_v48 }
 0x2a6   :  { %321 = vst [vmem:[%s535_s4] sm:$0xff] %v320_v53 }
 0x2a7   :  { %326 = vsyncpa [#allocation3], 1 }

</bundles_post_ra>
